<compile_context>
chip_gen: v7x
topology: tpu7x:2x2x1
jax: 0.10.0
libtpu: 0.0.40
codegen_flags: <defaults>
</compile_context>

<pallas_src>
import functools

import jax
import jax.numpy as jnp
from jax.experimental import pallas as pl
from jax.experimental.pallas import tpu as pltpu

_TB = 1024  # row tile when B is large; keeps per-block footprint tiny on all generations


def _zeros_kernel(o_ref):
    o_ref[...] = jnp.zeros_like(o_ref)


def _pallas_zero_logits(batch, num_classes, dtype=jnp.float32):
    """Zero-filled (batch, num_classes) array produced by a minimal Pallas kernel."""
    if batch <= _TB:
        # Single block, no grid, exact output shape. Launch + one tiny store.
        return pl.pallas_call(
            _zeros_kernel,
            out_shape=jax.ShapeDtypeStruct((batch, num_classes), dtype),
            out_specs=pl.BlockSpec(memory_space=pltpu.MemorySpace.VMEM),
        )()

    # Large B: tile over rows so the (double-buffered) output block stays far
    # below the scoped-VMEM limit on v5e (16 MiB) and v7x (64 MiB physical).
    return pl.pallas_call(
        _zeros_kernel,
        out_shape=jax.ShapeDtypeStruct((batch, num_classes), dtype),
        grid=(pl.cdiv(batch, _TB),),
        out_specs=pl.BlockSpec((_TB, num_classes), lambda i: (i, 0)),
        compiler_params=pltpu.CompilerParams(
            dimension_semantics=("parallel",)
        ),
    )()


@functools.partial(jax.jit, static_argnames=("num_classes", "return_feature"))
def identity_network_forward(x, num_classes=2, return_feature=False):
    """Pallas/JAX implementation of IdentityNetwork.forward.

    x: (B, C, H, W) array (NCHW layout).
    Returns logits (B, num_classes) of zeros and, optionally, the flattened
    feature (B, C*H*W).
    """
    B = x.shape[0]
    logits = _pallas_zero_logits(B, num_classes, jnp.float32)

    if return_feature:
        # Feature is bit-identical to the input: metadata-only reshape, no
        # HBM->VMEM->HBM round trip.
        feature = x.reshape(B, -1)
        return logits, feature
    return logits


if __name__ == "__main__":
    key = jax.random.PRNGKey(0)
    B, C, H, W = 2, 4, 16, 16
    num_classes = 2
    x = jax.random.normal(key, (B, C, H, W), dtype=jnp.float32)

    logits, feature = identity_network_forward(
        x, num_classes=num_classes, return_feature=True
    )
    jax.block_until_ready((logits, feature))

    # Correctness checks against the PyTorch semantics.
    assert logits.shape == (B, num_classes)
    assert logits.dtype == jnp.float32
    assert feature.shape == (B, C * H * W)
    assert bool(jnp.all(logits == 0.0))
    assert bool(jnp.allclose(feature, x.reshape(B, -1)))

    logits_only = identity_network_forward(x, num_classes=num_classes)
    jax.block_until_ready(logits_only)
    assert logits_only.shape == (B, num_classes)
    assert bool(jnp.all(logits_only == 0.0))

    print("KERNEL_OK")
</pallas_src>

<mosaic_0001>
module attributes {stable_mosaic.version = 11 : i64} {
  func.func @_zeros_kernel(%arg0: memref<2x2xf32, #tpu.memory_space<vmem>>) attributes {dimension_semantics = [], scalar_prefetch = 0 : i64, scratch_operands = 0 : i64, tpu.core_type = #tpu.core_type<tc>} {
    %cst = arith.constant 0.000000e+00 : f32
    %0 = vector.broadcast %cst : f32 to vector<2x2xf32>
    %c0 = arith.constant 0 : index
    %c0_0 = arith.constant 0 : index
    %1 = vector.load %arg0[%c0, %c0_0] : memref<2x2xf32, #tpu.memory_space<vmem>>, vector<2x2xf32>
    tpu.vector_store %arg0[%c0, %c0_0], %0 {strides = array<i32>} : memref<2x2xf32, #tpu.memory_space<vmem>>, vector<2x2xf32>,
    return
  }
}

</mosaic_0001>

<bundles_post_ra>
// kernel: identity_network_forward.1
= control target key start
LH: loop header
LB: loop body
LE: loop exit
PB: predicated region body
PF: predicated region fallthrough
CT: control target
= control target key end

     0   :  { %vm6_vm0 = vcmask 9216   ;;  %s67_s0 = inlined_call_operand.hbm [shape: f32[2,2], index: 0, kind: output, shape index: {}]  }
   0x1   :  { %5 = vsyncpa [#allocation3], 0  ;;  %v48_v0 = vmov 0.0   ;;  %s49_s3 = smov [#allocation2]  }
   0x2   :  { %7 = vst.msk [vmem:[#allocation2] sm:$0x3] %vm6_vm0, %v48_v0  ;;  %s14_s4 = sshll.u32 %s49_s3, 4  ;;  %s15_s4 = int_to_ptr.vmem [resolvable:$true] %s14_s4 }
   0x3   :  { %s24_s5 = scalar_lea.vmem %s15_s4, 32  ;;  %p29_p1 = scmp.lt.s32.totalorder %s15_s4, %s15_s4 }
   0x4   :  { %p25_p0 = scmp.ne.s32.totalorder %s15_s4, %s24_s5  ;;  %p30_p2 = scmp.lt.s32.totalorder %s24_s5, %s24_s5 }
   0x6   :  { %p31_p3 = por %p30_p2, %p29_p1 }
   0x8   :  { %p32_p4 = pnand %p31_p3, %p25_p0 }
   0xa   :  { %35 = shalt.err (!%p32_p4)
}
   0xb   :  { %s36_s8 = scalar_lea.hbm %s67_s0, 32 }
   0xc   :  { %p37_p5 = scmp.ne.s32.totalorder %s67_s0, %s36_s8  ;;  %p40_p6 = scmp.lt.u32.totalorder %s36_s8, %s67_s0 }
   0xe   :  { %p42_p7 = pnand %p40_p6, %p37_p5 }
  0x10   :  { %45 = shalt.err (!%p42_p7)
}
  0x11   :  { %17 = dma.vmem_to_hbm [thread:$0]  %s15_s4, 32, %s67_s0, [#allocation3]  }
  0x12   :  { %46 = dma.done.wait [#allocation3], 32  }
  0x13   :  { %47 = vsyncadd [#allocation3], 4294967264 }
  0x14   :  { %21 = vsyncpa [#allocation3], 1 }

</bundles_post_ra>
